<compile_context>
chip_gen: v5e
topology: v5e:2x2
jax: 0.10.0
libtpu: 0.0.40
codegen_flags: <defaults>
</compile_context>

<pallas_src>
import jax
import jax.numpy as jnp
from jax.experimental import pallas as pl
from jax.experimental.pallas import tpu as pltpu


def _bias_add_kernel(x_ref, b_ref, o_ref):
    # x_ref: (row_tile, col_tile) slab of the 2-D view of x.
    # b_ref: (row_tile, 1) bias column (layout A) or (1, col_tile) bias row
    #        (layout B).  Either way one VPU broadcast-add, hidden under DMA.
    o_ref[...] = x_ref[...] + b_ref[...]


def _tpu_budgets():
    """Returns (per-block byte budget for the x tile, scoped vmem_limit_bytes)."""
    block_budget = 8 << 20          # default: v6e-class (128 MiB physical VMEM)
    vmem_limit = 64 << 20
    vmem_cap = None
    try:
        vmem_cap = getattr(pltpu.get_tpu_info(), "vmem_capacity_bytes", None)
    except Exception:
        vmem_cap = None
    kind = ""
    try:
        kind = jax.devices()[0].device_kind.lower()
    except Exception:
        pass
    is_v7 = ((vmem_cap is not None and vmem_cap <= (64 << 20))
             or "v7" in kind or "7x" in kind)
    if is_v7:
        # v7x: 64 MiB physical VMEM. 2x in + 2x out @ 10 MiB = 40 MiB < 48 MiB.
        block_budget = 10 << 20
        vmem_limit = 48 << 20
    elif "v5" in kind:
        # v5e: slower HBM, 4 MiB blocks already amortize step overhead; the
        # 16 MiB scoped default must still be raised for 4 x 4 MiB buffers.
        block_budget = 4 << 20
        vmem_limit = 24 << 20
    return block_budget, vmem_limit


def _pick_tiles(rows, cols, itemsize, block_budget):
    """Choose (row_tile, col_tile) for a (rows, cols) streaming elementwise op."""
    sub = max(8, 32 // itemsize)             # sublane quantum: f32 8, bf16 16, i8 32
    budget_elems = max(sub * 128, block_budget // itemsize)
    if cols * sub <= budget_elems:
        # Full-width rows: a (row_tile, cols) block is one contiguous HBM burst.
        col_tile = cols
        rt = budget_elems // cols
        if rt >= rows:
            row_tile = rows
        else:
            row_tile = min(rows, max(sub, (rt // sub) * sub))
    else:
        # Very wide rows: lane-dense (multiple-of-128) column tiles, few rows.
        col_tile = min(cols, max(128, ((budget_elems // sub) // 128) * 128))
        row_tile = min(rows, sub)
    return row_tile, col_tile


def _ensure_two_blocks(rows, cols, row_tile, col_tile, itemsize):
    """Split a single-block grid on multi-MiB tensors so v7x's 2 TCs both work.

    Costs at most one extra ~0.35 us grid step on single-TC v5e/v6e.
    """
    total_bytes = rows * cols * itemsize
    if row_tile < rows or col_tile < cols or total_bytes < (2 << 20):
        return row_tile, col_tile
    sub = max(8, 32 // itemsize)
    if rows >= 2 * sub:
        return max(sub, ((rows // 2) // sub) * sub), col_tile
    if cols >= 256:
        return row_tile, max(128, ((cols // 2) // 128) * 128)
    return row_tile, col_tile


def learnable_bias_forward(x_nchw: jax.Array, bias_1c11: jax.Array) -> jax.Array:
    """out = x + bias.expand_as(x), with x in NCHW and bias in (1, C, 1, 1)."""
    n, c, h, w = x_nchw.shape
    assert bias_1c11.shape == (1, c, 1, 1)
    dtype = x_nchw.dtype
    itemsize = jnp.dtype(dtype).itemsize
    hw = h * w

    block_budget, vmem_limit = _tpu_budgets()

    if hw % 128 == 0:
        # Layout A: (N*C, H*W) contiguous view.  H*W is a multiple of 128 so
        # stores are unmasked full-width.  Bias is a tiny per-row column whose
        # block index is constant along the inner (cols) grid axis -> Pallas
        # does not re-DMA it per step.
        rows, cols = n * c, hw
        x2d = x_nchw.reshape(rows, cols)
        b_arr = (jnp.broadcast_to(bias_1c11.reshape(1, c), (n, c))
                 .reshape(rows, 1).astype(dtype))
        row_tile, col_tile = _pick_tiles(rows, cols, itemsize, block_budget)
        row_tile, col_tile = _ensure_two_blocks(rows, cols, row_tile, col_tile,
                                                itemsize)
        b_spec = pl.BlockSpec((row_tile, 1), lambda i, j: (i, 0))
        b_bytes = rows * itemsize
    else:
        # Layout B: (N, C*H*W) contiguous view with a precomputed (1, C*H*W)
        # bias row (bias repeated over H*W).  Keeps the lane axis dense for
        # non-128-multiple H*W (7x7, 14x14, ...), avoiding masked vst stores.
        rows, cols = n, c * hw
        x2d = x_nchw.reshape(rows, cols)
        b_arr = (jnp.broadcast_to(bias_1c11.reshape(c, 1), (c, hw))
                 .reshape(1, cols).astype(dtype))
        row_tile, col_tile = _pick_tiles(rows, cols, itemsize, block_budget)
        row_tile, col_tile = _ensure_two_blocks(rows, cols, row_tile, col_tile,
                                                itemsize)
        b_spec = pl.BlockSpec((1, col_tile), lambda i, j: (0, j))
        b_bytes = cols * itemsize

    # Grid order: cols innermost (keeps the layout-A bias block resident across
    # the inner loop).  Do not swap this order in future refactors.
    grid = (pl.cdiv(rows, row_tile), pl.cdiv(cols, col_tile))

    out2d = pl.pallas_call(
        _bias_add_kernel,
        out_shape=jax.ShapeDtypeStruct((rows, cols), dtype),
        grid_spec=pltpu.PrefetchScalarGridSpec(
            num_scalar_prefetch=0,
            grid=grid,
            in_specs=[
                pl.BlockSpec((row_tile, col_tile), lambda i, j: (i, j)),  # x slab
                b_spec,                                                   # bias
            ],
            out_specs=pl.BlockSpec((row_tile, col_tile), lambda i, j: (i, j)),
        ),
        compiler_params=pltpu.CompilerParams(
            dimension_semantics=("parallel", "parallel"),
            vmem_limit_bytes=vmem_limit),
        cost_estimate=pl.CostEstimate(
            flops=rows * cols,
            transcendentals=0,
            bytes_accessed=2 * rows * cols * itemsize + b_bytes),
    )(x2d, b_arr)

    return out2d.reshape(n, c, h, w)


if __name__ == "__main__":
    key = jax.random.PRNGKey(0)
    kx, kb, kx2 = jax.random.split(key, 3)

    # Primary check: lane-dense H*W path (layout A).
    N, C, H, W = 2, 4, 16, 16
    x = jax.random.normal(kx, (N, C, H, W), dtype=jnp.float32)
    # nn.Parameter(torch.zeros(1, out_chn, 1, 1)) -> zeros at init; perturb so
    # the broadcast path is actually exercised.
    bias = jnp.zeros((1, C, 1, 1), dtype=jnp.float32)
    bias = bias + jax.random.normal(kb, (1, C, 1, 1), jnp.float32) * 0.1

    out = jax.block_until_ready(learnable_bias_forward(x, bias))
    ref = x + bias
    assert out.shape == x.shape and out.dtype == x.dtype
    assert jnp.allclose(out, ref, atol=1e-6, rtol=1e-6)

    # Secondary check: non-128-multiple spatial size (layout B, 7x7 feature map).
    x7 = jax.random.normal(kx2, (N, C, 7, 7), dtype=jnp.float32)
    out7 = jax.block_until_ready(learnable_bias_forward(x7, bias))
    assert jnp.allclose(out7, x7 + bias, atol=1e-6, rtol=1e-6)

    print("KERNEL_OK")
</pallas_src>

<mosaic_0001>
module attributes {stable_mosaic.version = 11 : i64} {
  func.func @_bias_add_kernel(%arg0: i32, %arg1: i32, %arg2: memref<8x256xf32, #tpu.memory_space<vmem>>, %arg3: memref<8x1xf32, #tpu.memory_space<vmem>>, %arg4: memref<8x256xf32, #tpu.memory_space<vmem>>) attributes {dimension_semantics = [#tpu.dimension_semantics<parallel>, #tpu.dimension_semantics<parallel>], iteration_bounds = array<i64: 1, 1>, scalar_prefetch = 0 : i64, scratch_operands = 0 : i64, tpu.core_type = #tpu.core_type<tc>, window_params = [{transform_indices = @transform_0, window_bounds = array<i64: 8, 256>}, {transform_indices = @transform_1, window_bounds = array<i64: 8, 1>}, {transform_indices = @transform_2, window_bounds = array<i64: 8, 256>}]} {
    %c0 = arith.constant 0 : index
    %c0_0 = arith.constant 0 : index
    %0 = vector.load %arg2[%c0, %c0_0] : memref<8x256xf32, #tpu.memory_space<vmem>>, vector<8x256xf32>
    %c0_1 = arith.constant 0 : index
    %c0_2 = arith.constant 0 : index
    %1 = vector.load %arg3[%c0_1, %c0_2] : memref<8x1xf32, #tpu.memory_space<vmem>>, vector<8x1xf32>
    %2 = vector.broadcast %1 : vector<8x1xf32> to vector<8x256xf32>
    %3 = arith.addf %0, %2 : vector<8x256xf32>
    %c0_3 = arith.constant 0 : index
    %c0_4 = arith.constant 0 : index
    %4 = vector.load %arg4[%c0_3, %c0_4] : memref<8x256xf32, #tpu.memory_space<vmem>>, vector<8x256xf32>
    tpu.vector_store %arg4[%c0_3, %c0_4], %3 {strides = array<i32>} : memref<8x256xf32, #tpu.memory_space<vmem>>, vector<8x256xf32>,
    return
  }
  func.func @transform_0(%arg0: i32, %arg1: i32) -> (i32, i32) {
    %c0_i32 = arith.constant 0 : i32
    return %arg0, %arg1 : i32, i32
  }
  func.func @transform_1(%arg0: i32, %arg1: i32) -> (i32, i32) {
    %c0_i32 = arith.constant 0 : i32
    %c0_i32_0 = arith.constant 0 : i32
    return %arg0, %c0_i32 : i32, i32
  }
  func.func @transform_2(%arg0: i32, %arg1: i32) -> (i32, i32) {
    %c0_i32 = arith.constant 0 : i32
    return %arg0, %arg1 : i32, i32
  }
}

</mosaic_0001>

<bundles_post_ra>
// kernel: tpu_custom_call.1
= control target key start
LH: loop header
LB: loop body
LE: loop exit
PB: predicated region body
PF: predicated region fallthrough
CT: control target
= control target key end

     0   :  { %7 = vsyncpa [#allocation3], 0  ;;  %s138_s0 = inlined_call_operand.hbm [shape: f32[8,256], index: 0, kind: input, shape index: {}]   ;;  %s139_s1 = inlined_call_operand.vmem [shape: f32[8,1], index: 1, kind: input, shape index: {}]   ;;  %s140_s2 = inlined_call_operand.hbm [shape: f32[8,256], index: 2, kind: output, shape index: {}]  }
   0x1   :  { %8 = vsyncpa [#allocation4], 0  ;;  %s14_s11 = sshll.u32 %s138_s0, 4  ;;  %s111_s12 = smov [#allocation2]   ;;  %s15_s11 = int_to_ptr.hbm [resolvable:$true] %s14_s11 }
   0x2   :  { %s16_s13 = sshll.u32 %s111_s12, 4  ;;  %s17_s13 = int_to_ptr.vmem [resolvable:$true] %s16_s13 }
   0x3   :  { %19 = dma.hbm_to_vmem [thread:$0]  %s15_s11, 256, %s17_s13, [#allocation3]  }
   0x4   :  { %107 = dma.done.wait [#allocation3], 256  }
   0x5   :  { %108 = vsyncadd [#allocation3], 4294967040  ;;  %v112_v0 = vmov 0   ;;  %v28_v1 = vld [vmem:[%s139_s1] sm:$0xff]  ;;  %v27_v3 = vld [vmem:[#allocation2 + $0x8] sm:$0xff]  ;;  %s113_s16 = smov [#allocation5]  }
   0x6   :  { %58 = vset.pattern.permute.xlu0 %v112_v0  ;;  %v26_v2 = vld [vmem:[#allocation2] sm:$0xff]  ;;  %s43_s17 = sshll.u32 %s113_s16, 4  ;;  %s45_s19 = sshll.u32 %s140_s2, 4  ;;  %s44_s17 = int_to_ptr.vmem [resolvable:$true] %s43_s17  ;;  %s46_s19 = int_to_ptr.hbm [resolvable:$true] %s45_s19 }
   0x7   :  { %31 = vperm.xlu0 %58, %v28_v1  }
  0x79   :  { %v32_v4 = vpop.permute.xlu0 %31 }
  0x7a   :  { %v34_v5 = vadd.f32 %v32_v4, %v26_v2  ;;  %v35_v6 = vadd.f32 %v32_v4, %v27_v3 }
  0x7c   :  { %36 = vst [vmem:[#allocation5] sm:$0xff] %v34_v5 }
  0x7d   :  { %37 = vst [vmem:[#allocation5 + $0x8] sm:$0xff] %v35_v6 }
  0x7e   :  { %48 = dma.vmem_to_hbm [thread:$0]  %s44_s17, 256, %s46_s19, [#allocation4]  }
  0x7f   :  { %109 = dma.done.wait [#allocation4], 256  }
  0x80   :  { %110 = vsyncadd [#allocation4], 4294967040 }
  0x81   :  { %53 = vsyncpa [#allocation3], 1 }
  0x82   :  { %54 = vsyncpa [#allocation4], 1 }

</bundles_post_ra>
